<compile_context>
chip_gen: v7x
topology: tpu7x:2x2x1
jax: 0.10.0
libtpu: 0.0.40
codegen_flags: <defaults>
</compile_context>

<pallas_src>
import jax
import jax.numpy as jnp
from jax.experimental import pallas as pl
from jax.experimental.pallas import tpu as pltpu


def _round_up(x, m):
    return ((x + m - 1) // m) * m


def _largest_divisor(n, candidates):
    for c in candidates:
        if n % c == 0:
            return c
    return 1


def _has_two_tensorcores():
    # Only v7x has 2 TensorCores per chip; on v5e/v6e a batch split is pure
    # serial overhead, so gate it.
    try:
        return "v7" in jax.devices()[0].device_kind.lower()
    except Exception:
        return False


# ---------------------------------------------------------------------------
# Kernel A (small vocab): recurrence with the output projection fused into the
# per-chunk epilogue.  Grid = (batch_blocks, time_chunks).
# emb_ref already contains bf16( W_ih^T[token] + (b_ih + b_hh) ) per step.
# ---------------------------------------------------------------------------
def rnn_fused_kernel(emb_ref, whh_ref, h0_ref, wout_ref, bout_ref,
                     o_ref, hcarry_ref, ychunk_ref):
    c = pl.program_id(1)

    @pl.when(c == 0)
    def _():
        # first chunk of this batch block: initialize the resident carry.
        hcarry_ref[...] = h0_ref[...]

    whh = whh_ref[...]                       # (Hp, Hp) bf16, hoisted out of loop
    t_chunk, b_block, hp = ychunk_ref.shape
    vp = o_ref.shape[-1]

    def step(t, h):
        pre = emb_ref[t].astype(jnp.float32) + jnp.dot(
            h.astype(jnp.bfloat16), whh, preferred_element_type=jnp.float32)
        h_new = jnp.tanh(pre)                # tanh / carry stay f32
        ychunk_ref[t] = h_new.astype(jnp.bfloat16)
        return h_new

    h = jax.lax.fori_loop(0, t_chunk, step, hcarry_ref[...], unroll=True)
    hcarry_ref[...] = h                      # one store per chunk; resident carry

    # Fused per-chunk projection: one (t_chunk*b_block, Hp) @ (Hp, Vp) matmul.
    y2d = ychunk_ref[...].reshape(t_chunk * b_block, hp)
    o2d = (jnp.dot(y2d, wout_ref[...], preferred_element_type=jnp.float32)
           + bout_ref[...])
    o_ref[...] = o2d.reshape(t_chunk, b_block, vp)


# ---------------------------------------------------------------------------
# Kernel B1 (large vocab): sequential recurrence emitting bf16 hidden states.
# ---------------------------------------------------------------------------
def rnn_recurrence_kernel(emb_ref, whh_ref, h0_ref, y_ref, hcarry_ref):
    c = pl.program_id(1)

    @pl.when(c == 0)
    def _():
        hcarry_ref[...] = h0_ref[...]

    whh = whh_ref[...]
    t_chunk = emb_ref.shape[0]

    def step(t, h):
        pre = emb_ref[t].astype(jnp.float32) + jnp.dot(
            h.astype(jnp.bfloat16), whh, preferred_element_type=jnp.float32)
        h_new = jnp.tanh(pre)
        y_ref[t] = h_new.astype(jnp.bfloat16)       # bf16 writeback
        return h_new

    h = jax.lax.fori_loop(0, t_chunk, step, hcarry_ref[...], unroll=True)
    hcarry_ref[...] = h


# ---------------------------------------------------------------------------
# Kernel B2 (large vocab): parallel-tiled output projection over all rows.
# ---------------------------------------------------------------------------
def proj_kernel(y_ref, w_ref, b_ref, o_ref):
    o_ref[...] = (jnp.dot(y_ref[...], w_ref[...],
                          preferred_element_type=jnp.float32) + b_ref[...])


def rnn_model_forward(inputs, state, params, *, t_chunk=None, fuse_projection=None):
    """inputs: (batch, seq) int32 token ids. state: (1, batch, hidden) f32."""
    w_ih, w_hh = params["w_ih"], params["w_hh"]
    b_ih, b_hh = params["b_ih"], params["b_hh"]
    w_lin, b_lin = params["w_lin"], params["b_lin"]

    hidden, vocab = w_ih.shape              # W_ih: (hidden, vocab)
    batch, seq = inputs.shape

    hp = _round_up(hidden, 128)
    bp = _round_up(batch, 8)

    # --- bf16 embedding gather (bias folded once, pre-padded -> no pad copy) --
    wih_t_p = jnp.zeros((vocab, hp), jnp.bfloat16).at[:, :hidden].set(
        (w_ih.T + (b_ih + b_hh)[None, :]).astype(jnp.bfloat16))
    tok_p = jnp.zeros((seq, bp), jnp.int32).at[:, :batch].set(inputs.T)
    emb_p = jnp.take(wih_t_p, tok_p, axis=0)            # (S, Bp, Hp) bf16

    whh_p = jnp.zeros((hp, hp), jnp.bfloat16).at[:hidden, :hidden].set(
        w_hh.T.astype(jnp.bfloat16))
    h0_p = jnp.zeros((bp, hp), jnp.float32).at[:batch, :hidden].set(state[0])

    # --- time chunking --------------------------------------------------------
    if t_chunk is None:
        # TODO(synk): odd seq lengths fall back to tiny chunks; consider padding seq.
        t_chunk = _largest_divisor(seq, (64, 32, 16, 8, 4, 2))
    assert seq % t_chunk == 0, "t_chunk must divide seq"
    n_chunks = seq // t_chunk

    # --- batch split only where there are 2 TensorCores (v7x) ----------------
    nb = 2 if (_has_two_tensorcores() and bp >= 16 and bp % 16 == 0) else 1
    b_block = bp // nb

    vmem_limit = 64 * 1024 * 1024           # raised scoped-VMEM budget

    vp_small = _round_up(vocab, 128)
    if fuse_projection is None:
        fuse_projection = vp_small <= 256

    if fuse_projection:
        # ---------------- fused path: single pallas_call ----------------------
        vp = vp_small
        wout_p = jnp.zeros((hp, vp), jnp.bfloat16).at[:hidden, :vocab].set(
            w_lin.T.astype(jnp.bfloat16))
        bout_p = jnp.zeros((1, vp), jnp.float32).at[0, :vocab].set(b_lin)

        o_p, h_fin_p = pl.pallas_call(
            rnn_fused_kernel,
            out_shape=(
                jax.ShapeDtypeStruct((seq, bp, vp), jnp.float32),   # projected outputs
                jax.ShapeDtypeStruct((bp, hp), jnp.float32),        # final hidden state
            ),
            grid_spec=pltpu.PrefetchScalarGridSpec(
                num_scalar_prefetch=0,
                grid=(nb, n_chunks),
                in_specs=[
                    pl.BlockSpec((t_chunk, b_block, hp), lambda b, c: (c, b, 0)),  # emb
                    pl.BlockSpec((hp, hp), lambda b, c: (0, 0)),                   # W_hh^T
                    pl.BlockSpec((b_block, hp), lambda b, c: (b, 0)),              # h0
                    pl.BlockSpec((hp, vp), lambda b, c: (0, 0)),                   # W_lin^T
                    pl.BlockSpec((1, vp), lambda b, c: (0, 0)),                    # b_lin
                ],
                out_specs=[
                    pl.BlockSpec((t_chunk, b_block, vp), lambda b, c: (c, b, 0)),  # o chunk
                    pl.BlockSpec((b_block, hp), lambda b, c: (b, 0)),              # carry
                ],
                scratch_shapes=[pltpu.VMEM((t_chunk, b_block, hp), jnp.bfloat16)],
            ),
            compiler_params=pltpu.CompilerParams(
                dimension_semantics=("parallel", "arbitrary"),
                vmem_limit_bytes=vmem_limit),
        )(emb_p, whh_p, h0_p, wout_p, bout_p)

        output = o_p[:, :batch, :vocab].reshape(seq * batch, vocab)
        new_state = h_fin_p[:batch, :hidden][None, :, :]
        return output, new_state

    # ---------------- unfused path: recurrence + parallel projection ---------
    y_p, h_fin_p = pl.pallas_call(
        rnn_recurrence_kernel,
        out_shape=(
            jax.ShapeDtypeStruct((seq, bp, hp), jnp.bfloat16),      # all hidden states
            jax.ShapeDtypeStruct((bp, hp), jnp.float32),            # final hidden state
        ),
        grid_spec=pltpu.PrefetchScalarGridSpec(
            num_scalar_prefetch=0,
            grid=(nb, n_chunks),
            in_specs=[
                pl.BlockSpec((t_chunk, b_block, hp), lambda b, c: (c, b, 0)),
                pl.BlockSpec((hp, hp), lambda b, c: (0, 0)),
                pl.BlockSpec((b_block, hp), lambda b, c: (b, 0)),
            ],
            out_specs=[
                pl.BlockSpec((t_chunk, b_block, hp), lambda b, c: (c, b, 0)),
                pl.BlockSpec((b_block, hp), lambda b, c: (b, 0)),
            ],
        ),
        compiler_params=pltpu.CompilerParams(
            dimension_semantics=("parallel", "arbitrary"),
            vmem_limit_bytes=vmem_limit),
    )(emb_p, whh_p, h0_p)

    # Feed y directly (free contiguous reshape), slice padded batch rows after.
    m = seq * bp
    tm = _largest_divisor(m, (512, 256, 128, 64, 32, 16, 8))
    tn = 256 if vocab > 128 else 128
    vp = _round_up(vocab, tn)

    y2d = y_p.reshape(m, hp)
    wout_p = jnp.zeros((hp, vp), jnp.bfloat16).at[:hidden, :vocab].set(
        w_lin.T.astype(jnp.bfloat16))
    bout_p = jnp.zeros((1, vp), jnp.float32).at[0, :vocab].set(b_lin)

    out_p = pl.pallas_call(
        proj_kernel,
        out_shape=jax.ShapeDtypeStruct((m, vp), jnp.float32),
        grid_spec=pltpu.PrefetchScalarGridSpec(
            num_scalar_prefetch=0,
            grid=(m // tm, vp // tn),
            in_specs=[
                pl.BlockSpec((tm, hp), lambda i, j: (i, 0)),   # y rows (bf16)
                pl.BlockSpec((hp, tn), lambda i, j: (0, j)),   # W_lin^T cols
                pl.BlockSpec((1, tn), lambda i, j: (0, j)),    # b_lin cols
            ],
            out_specs=pl.BlockSpec((tm, tn), lambda i, j: (i, j)),
        ),
        compiler_params=pltpu.CompilerParams(
            dimension_semantics=("parallel", "parallel"),
            vmem_limit_bytes=vmem_limit),
    )(y2d, wout_p, bout_p)

    output = out_p.reshape(seq, bp, vp)[:, :batch, :vocab].reshape(seq * batch, vocab)
    new_state = h_fin_p[:batch, :hidden][None, :, :]
    return output, new_state


def init_params(key, vocab_size, hidden_size):
    ks = jax.random.split(key, 6)
    s = 1.0 / jnp.sqrt(hidden_size)
    return {
        "w_ih": jax.random.uniform(ks[0], (hidden_size, vocab_size), jnp.float32, -s, s),
        "w_hh": jax.random.uniform(ks[1], (hidden_size, hidden_size), jnp.float32, -s, s),
        "b_ih": jax.random.uniform(ks[2], (hidden_size,), jnp.float32, -s, s),
        "b_hh": jax.random.uniform(ks[3], (hidden_size,), jnp.float32, -s, s),
        "w_lin": jax.random.uniform(ks[4], (vocab_size, hidden_size), jnp.float32, -s, s),
        "b_lin": jax.random.uniform(ks[5], (vocab_size,), jnp.float32, -s, s),
    }


def _reference_forward(inputs, state, params):
    """Pure-JAX f32 reference of the PyTorch forward for verification."""
    vocab = params["w_ih"].shape[1]
    x = jax.nn.one_hot(inputs.T, vocab, dtype=jnp.float32)   # (S, B, V)
    h = state[0]

    def step(h, x_t):
        h = jnp.tanh(x_t @ params["w_ih"].T + params["b_ih"]
                     + h @ params["w_hh"].T + params["b_hh"])
        return h, h

    h_final, ys = jax.lax.scan(step, h, x)
    y = ys.reshape(-1, ys.shape[-1])
    out = y @ params["w_lin"].T + params["b_lin"]
    return out, h_final[None]


if __name__ == "__main__":
    vocab_size = 16
    hidden_size = 32
    batch = 2
    seq = 8

    key = jax.random.PRNGKey(0)
    k_tok, k_par = jax.random.split(key)

    inputs = jax.random.randint(k_tok, (batch, seq), 0, vocab_size, dtype=jnp.int32)
    state = jnp.zeros((1, batch, hidden_size), jnp.float32)   # begin_state (nn.RNN case)
    params = init_params(k_par, vocab_size, hidden_size)

    ref_out, ref_state = _reference_forward(inputs, state, params)

    # Fused path (small padded vocab): single pallas_call, projection in epilogue.
    out, new_state = rnn_model_forward(inputs, state, params,
                                       t_chunk=4, fuse_projection=True)
    out = jax.block_until_ready(out)
    new_state = jax.block_until_ready(new_state)
    assert out.shape == (seq * batch, vocab_size)
    assert new_state.shape == (1, batch, hidden_size)
    # bf16 matmul operands / bf16 staged y (f32 accumulation, tanh, carry).
    assert jnp.allclose(out, ref_out, atol=5e-2, rtol=5e-2)
    assert jnp.allclose(new_state, ref_state, atol=5e-2, rtol=5e-2)

    # Unfused path (exercises the large-vocab code path: recurrence + tiled proj).
    out2, new_state2 = rnn_model_forward(inputs, state, params,
                                         t_chunk=4, fuse_projection=False)
    out2 = jax.block_until_ready(out2)
    new_state2 = jax.block_until_ready(new_state2)
    assert jnp.allclose(out2, ref_out, atol=5e-2, rtol=5e-2)
    assert jnp.allclose(new_state2, ref_state, atol=5e-2, rtol=5e-2)

    print("KERNEL_OK")
</pallas_src>

<mosaic_0001>
module attributes {stable_mosaic.version = 11 : i64} {
  func.func @rnn_fused_kernel(%arg0: i32, %arg1: i32, %arg2: memref<4x8x128xbf16, #tpu.memory_space<vmem>>, %arg3: memref<128x128xbf16, #tpu.memory_space<vmem>>, %arg4: memref<8x128xf32, #tpu.memory_space<vmem>>, %arg5: memref<128x128xbf16, #tpu.memory_space<vmem>>, %arg6: memref<1x128xf32, #tpu.memory_space<vmem>>, %arg7: memref<4x8x128xf32, #tpu.memory_space<vmem>>, %arg8: memref<8x128xf32, #tpu.memory_space<vmem>>, %arg9: memref<4x8x128xbf16, #tpu.memory_space<vmem>>) attributes {dimension_semantics = [#tpu.dimension_semantics<parallel>, #tpu.dimension_semantics<arbitrary>], iteration_bounds = array<i64: 1, 2>, scalar_prefetch = 0 : i64, scratch_operands = 1 : i64, tpu.core_type = #tpu.core_type<tc>, window_params = [{transform_indices = @transform_0, window_bounds = array<i64: 4, 8, 128>}, {pipeline_mode = #tpu.pipeline_mode<synchronous>, transform_indices = @transform_1, window_bounds = array<i64: 128, 128>}, {transform_indices = @transform_2, window_bounds = array<i64: 8, 128>}, {pipeline_mode = #tpu.pipeline_mode<synchronous>, transform_indices = @transform_3, window_bounds = array<i64: 128, 128>}, {pipeline_mode = #tpu.pipeline_mode<synchronous>, transform_indices = @transform_4, window_bounds = array<i64: 1, 128>}, {transform_indices = @transform_5, window_bounds = array<i64: 4, 8, 128>}, {transform_indices = @transform_6, window_bounds = array<i64: 8, 128>}]} {
    %c0_i32 = arith.constant 0 : i32
    %0 = arith.cmpi eq, %arg1, %c0_i32 : i32
    %1 = arith.extui %0 : i1 to i32
    %c0_i32_0 = arith.constant 0 : i32
    %2 = arith.cmpi ne, %1, %c0_i32_0 : i32
    scf.if %2 {
      %c0_37 = arith.constant 0 : index
      %c0_38 = arith.constant 0 : index
      %67 = vector.load %arg4[%c0_37, %c0_38] : memref<8x128xf32, #tpu.memory_space<vmem>>, vector<8x128xf32>
      %c0_39 = arith.constant 0 : index
      %c0_40 = arith.constant 0 : index
      %68 = vector.load %arg8[%c0_39, %c0_40] : memref<8x128xf32, #tpu.memory_space<vmem>>, vector<8x128xf32>
      tpu.vector_store %arg8[%c0_39, %c0_40], %67 {strides = array<i32>} : memref<8x128xf32, #tpu.memory_space<vmem>>, vector<8x128xf32>,
    } else {
    }
    %c0 = arith.constant 0 : index
    %c0_1 = arith.constant 0 : index
    %3 = vector.load %arg3[%c0, %c0_1] : memref<128x128xbf16, #tpu.memory_space<vmem>>, vector<128x128xbf16>
    %c0_2 = arith.constant 0 : index
    %c0_3 = arith.constant 0 : index
    %4 = vector.load %arg8[%c0_2, %c0_3] : memref<8x128xf32, #tpu.memory_space<vmem>>, vector<8x128xf32>
    %c0_i32_4 = arith.constant 0 : i32
    %5 = arith.index_cast %c0_i32_4 : i32 to index
    %c0_5 = arith.constant 0 : index
    %c0_6 = arith.constant 0 : index
    %6 = vector.load %arg2[%5, %c0_5, %c0_6] : memref<4x8x128xbf16, #tpu.memory_space<vmem>>, vector<1x8x128xbf16>
    %7 = vector.shape_cast %6 : vector<1x8x128xbf16> to vector<8x128xbf16>
    %8 = arith.extf %7 : vector<8x128xbf16> to vector<8x128xf32>
    %9 = arith.truncf %4 : vector<8x128xf32> to vector<8x128xbf16>
    %cst = arith.constant dense<0.000000e+00> : vector<8x128xf32>
    %10 = tpu.matmul %9, %3, %cst {dimension_numbers = #tpu.dot_dimension_numbers<[1], [0], [0], [1], [0, 0, 1, 1], [], []>} : vector<8x128xbf16>, vector<128x128xbf16>, vector<8x128xf32> -> vector<8x128xf32>
    %11 = arith.addf %8, %10 : vector<8x128xf32>
    %12 = math.tanh %11 : vector<8x128xf32>
    %13 = arith.truncf %12 : vector<8x128xf32> to vector<8x128xbf16>
    %14 = arith.index_cast %c0_i32_4 : i32 to index
    %c0_7 = arith.constant 0 : index
    %c0_8 = arith.constant 0 : index
    %15 = vector.load %arg9[%14, %c0_7, %c0_8] : memref<4x8x128xbf16, #tpu.memory_space<vmem>>, vector<1x8x128xbf16>
    %16 = vector.shape_cast %15 : vector<1x8x128xbf16> to vector<8x128xbf16>
    %17 = vector.shape_cast %13 : vector<8x128xbf16> to vector<1x8x128xbf16>
    tpu.vector_store %arg9[%14, %c0_7, %c0_8], %17 {strides = array<i32>} : memref<4x8x128xbf16, #tpu.memory_space<vmem>>, vector<1x8x128xbf16>,
    %c1_i32 = arith.constant 1 : i32
    %18 = arith.index_cast %c1_i32 : i32 to index
    %c0_9 = arith.constant 0 : index
    %c0_10 = arith.constant 0 : index
    %19 = vector.load %arg2[%18, %c0_9, %c0_10] : memref<4x8x128xbf16, #tpu.memory_space<vmem>>, vector<1x8x128xbf16>
    %20 = vector.shape_cast %19 : vector<1x8x128xbf16> to vector<8x128xbf16>
    %21 = arith.extf %20 : vector<8x128xbf16> to vector<8x128xf32>
    %22 = arith.truncf %12 : vector<8x128xf32> to vector<8x128xbf16>
    %cst_11 = arith.constant dense<0.000000e+00> : vector<8x128xf32>
    %23 = tpu.matmul %22, %3, %cst_11 {dimension_numbers = #tpu.dot_dimension_numbers<[1], [0], [0], [1], [0, 0, 1, 1], [], []>} : vector<8x128xbf16>, vector<128x128xbf16>, vector<8x128xf32> -> vector<8x128xf32>
    %24 = arith.addf %21, %23 : vector<8x128xf32>
    %25 = math.tanh %24 : vector<8x128xf32>
    %26 = arith.truncf %25 : vector<8x128xf32> to vector<8x128xbf16>
    %27 = arith.index_cast %c1_i32 : i32 to index
    %c0_12 = arith.constant 0 : index
    %c0_13 = arith.constant 0 : index
    %28 = vector.load %arg9[%27, %c0_12, %c0_13] : memref<4x8x128xbf16, #tpu.memory_space<vmem>>, vector<1x8x128xbf16>
    %29 = vector.shape_cast %28 : vector<1x8x128xbf16> to vector<8x128xbf16>
    %30 = vector.shape_cast %26 : vector<8x128xbf16> to vector<1x8x128xbf16>
    tpu.vector_store %arg9[%27, %c0_12, %c0_13], %30 {strides = array<i32>} : memref<4x8x128xbf16, #tpu.memory_space<vmem>>, vector<1x8x128xbf16>,
    %c2_i32 = arith.constant 2 : i32
    %31 = arith.index_cast %c2_i32 : i32 to index
    %c0_14 = arith.constant 0 : index
    %c0_15 = arith.constant 0 : index
    %32 = vector.load %arg2[%31, %c0_14, %c0_15] : memref<4x8x128xbf16, #tpu.memory_space<vmem>>, vector<1x8x128xbf16>
    %33 = vector.shape_cast %32 : vector<1x8x128xbf16> to vector<8x128xbf16>
    %34 = arith.extf %33 : vector<8x128xbf16> to vector<8x128xf32>
    %35 = arith.truncf %25 : vector<8x128xf32> to vector<8x128xbf16>
    %cst_16 = arith.constant dense<0.000000e+00> : vector<8x128xf32>
    %36 = tpu.matmul %35, %3, %cst_16 {dimension_numbers = #tpu.dot_dimension_numbers<[1], [0], [0], [1], [0, 0, 1, 1], [], []>} : vector<8x128xbf16>, vector<128x128xbf16>, vector<8x128xf32> -> vector<8x128xf32>
    %37 = arith.addf %34, %36 : vector<8x128xf32>
    %38 = math.tanh %37 : vector<8x128xf32>
    %39 = arith.truncf %38 : vector<8x128xf32> to vector<8x128xbf16>
    %40 = arith.index_cast %c2_i32 : i32 to index
    %c0_17 = arith.constant 0 : index
    %c0_18 = arith.constant 0 : index
    %41 = vector.load %arg9[%40, %c0_17, %c0_18] : memref<4x8x128xbf16, #tpu.memory_space<vmem>>, vector<1x8x128xbf16>
    %42 = vector.shape_cast %41 : vector<1x8x128xbf16> to vector<8x128xbf16>
    %43 = vector.shape_cast %39 : vector<8x128xbf16> to vector<1x8x128xbf16>
    tpu.vector_store %arg9[%40, %c0_17, %c0_18], %43 {strides = array<i32>} : memref<4x8x128xbf16, #tpu.memory_space<vmem>>, vector<1x8x128xbf16>,
    %c3_i32 = arith.constant 3 : i32
    %44 = arith.index_cast %c3_i32 : i32 to index
    %c0_19 = arith.constant 0 : index
    %c0_20 = arith.constant 0 : index
    %45 = vector.load %arg2[%44, %c0_19, %c0_20] : memref<4x8x128xbf16, #tpu.memory_space<vmem>>, vector<1x8x128xbf16>
    %46 = vector.shape_cast %45 : vector<1x8x128xbf16> to vector<8x128xbf16>
    %47 = arith.extf %46 : vector<8x128xbf16> to vector<8x128xf32>
    %48 = arith.truncf %38 : vector<8x128xf32> to vector<8x128xbf16>
    %cst_21 = arith.constant dense<0.000000e+00> : vector<8x128xf32>
    %49 = tpu.matmul %48, %3, %cst_21 {dimension_numbers = #tpu.dot_dimension_numbers<[1], [0], [0], [1], [0, 0, 1, 1], [], []>} : vector<8x128xbf16>, vector<128x128xbf16>, vector<8x128xf32> -> vector<8x128xf32>
    %50 = arith.addf %47, %49 : vector<8x128xf32>
    %51 = math.tanh %50 : vector<8x128xf32>
    %52 = arith.truncf %51 : vector<8x128xf32> to vector<8x128xbf16>
    %53 = arith.index_cast %c3_i32 : i32 to index
    %c0_22 = arith.constant 0 : index
    %c0_23 = arith.constant 0 : index
    %54 = vector.load %arg9[%53, %c0_22, %c0_23] : memref<4x8x128xbf16, #tpu.memory_space<vmem>>, vector<1x8x128xbf16>
    %55 = vector.shape_cast %54 : vector<1x8x128xbf16> to vector<8x128xbf16>
    %56 = vector.shape_cast %52 : vector<8x128xbf16> to vector<1x8x128xbf16>
    tpu.vector_store %arg9[%53, %c0_22, %c0_23], %56 {strides = array<i32>} : memref<4x8x128xbf16, #tpu.memory_space<vmem>>, vector<1x8x128xbf16>,
    %c4_i32 = arith.constant 4 : i32
    %c0_24 = arith.constant 0 : index
    %c0_25 = arith.constant 0 : index
    %57 = vector.load %arg8[%c0_24, %c0_25] : memref<8x128xf32, #tpu.memory_space<vmem>>, vector<8x128xf32>
    tpu.vector_store %arg8[%c0_24, %c0_25], %51 {strides = array<i32>} : memref<8x128xf32, #tpu.memory_space<vmem>>, vector<8x128xf32>,
    %c0_26 = arith.constant 0 : index
    %c0_27 = arith.constant 0 : index
    %c0_28 = arith.constant 0 : index
    %58 = vector.load %arg9[%c0_26, %c0_27, %c0_28] : memref<4x8x128xbf16, #tpu.memory_space<vmem>>, vector<4x8x128xbf16>
    %59 = vector.shape_cast %58 : vector<4x8x128xbf16> to vector<32x128xbf16>
    %c0_29 = arith.constant 0 : index
    %c0_30 = arith.constant 0 : index
    %60 = vector.load %arg5[%c0_29, %c0_30] : memref<128x128xbf16, #tpu.memory_space<vmem>>, vector<128x128xbf16>
    %cst_31 = arith.constant dense<0.000000e+00> : vector<32x128xf32>
    %61 = tpu.matmul %59, %60, %cst_31 {dimension_numbers = #tpu.dot_dimension_numbers<[1], [0], [0], [1], [0, 0, 1, 1], [], []>} : vector<32x128xbf16>, vector<128x128xbf16>, vector<32x128xf32> -> vector<32x128xf32>
    %c0_32 = arith.constant 0 : index
    %c0_33 = arith.constant 0 : index
    %62 = vector.load %arg6[%c0_32, %c0_33] : memref<1x128xf32, #tpu.memory_space<vmem>>, vector<1x128xf32>
    %63 = vector.broadcast %62 : vector<1x128xf32> to vector<32x128xf32>
    %64 = arith.addf %61, %63 : vector<32x128xf32>
    %65 = vector.shape_cast %64 : vector<32x128xf32> to vector<4x8x128xf32>
    %c0_34 = arith.constant 0 : index
    %c0_35 = arith.constant 0 : index
    %c0_36 = arith.constant 0 : index
    %66 = vector.load %arg7[%c0_34, %c0_35, %c0_36] : memref<4x8x128xf32, #tpu.memory_space<vmem>>, vector<4x8x128xf32>
    tpu.vector_store %arg7[%c0_34, %c0_35, %c0_36], %65 {strides = array<i32>} : memref<4x8x128xf32, #tpu.memory_space<vmem>>, vector<4x8x128xf32>,
    return
  }
  func.func @transform_0(%arg0: i32, %arg1: i32) -> (i32, i32, i32) {
    %c0_i32 = arith.constant 0 : i32
    %c0_i32_0 = arith.constant 0 : i32
    return %arg1, %arg0, %c0_i32 : i32, i32, i32
  }
  func.func @transform_1(%arg0: i32, %arg1: i32) -> (i32, i32) {
    %c0_i32 = arith.constant 0 : i32
    %c0_i32_0 = arith.constant 0 : i32
    %c0_i32_1 = arith.constant 0 : i32
    return %c0_i32, %c0_i32_0 : i32, i32
  }
  func.func @transform_2(%arg0: i32, %arg1: i32) -> (i32, i32) {
    %c0_i32 = arith.constant 0 : i32
    %c0_i32_0 = arith.constant 0 : i32
    return %arg0, %c0_i32 : i32, i32
  }
  func.func @transform_3(%arg0: i32, %arg1: i32) -> (i32, i32) {
    %c0_i32 = arith.constant 0 : i32
    %c0_i32_0 = arith.constant 0 : i32
    %c0_i32_1 = arith.constant 0 : i32
    return %c0_i32, %c0_i32_0 : i32, i32
  }
  func.func @transform_4(%arg0: i32, %arg1: i32) -> (i32, i32) {
    %c0_i32 = arith.constant 0 : i32
    %c0_i32_0 = arith.constant 0 : i32
    %c0_i32_1 = arith.constant 0 : i32
    return %c0_i32, %c0_i32_0 : i32, i32
  }
  func.func @transform_5(%arg0: i32, %arg1: i32) -> (i32, i32, i32) {
    %c0_i32 = arith.constant 0 : i32
    %c0_i32_0 = arith.constant 0 : i32
    return %arg1, %arg0, %c0_i32 : i32, i32, i32
  }
  func.func @transform_6(%arg0: i32, %arg1: i32) -> (i32, i32) {
    %c0_i32 = arith.constant 0 : i32
    %c0_i32_0 = arith.constant 0 : i32
    return %arg0, %c0_i32 : i32, i32
  }
}

</mosaic_0001>

<bundles_post_ra>
// kernel: tpu_custom_call.1
= control target key start
LH: loop header
LB: loop body
LE: loop exit
PB: predicated region body
PF: predicated region fallthrough
CT: control target
= control target key end

     0   :  { %s1980_s0 = inlined_call_operand.hbm [shape: bf16[8,8,128], index: 0, kind: input, shape index: {}]   ;;  %s1981_s1 = inlined_call_operand.hbm [shape: bf16[128,128], index: 1, kind: input, shape index: {}]   ;;  %s1982_s2 = inlined_call_operand.hbm [shape: f32[8,128], index: 2, kind: input, shape index: {}]   ;;  %s1983_s3 = inlined_call_operand.hbm [shape: bf16[128,128], index: 3, kind: input, shape index: {}]   ;;  %s1984_s4 = inlined_call_operand.hbm [shape: f32[1,128], index: 4, kind: input, shape index: {}]   ;;  %s1985_s5 = inlined_call_operand.hbm [shape: f32[8,8,128], index: 5, kind: output, shape index: {0}]   ;;  %s1986_s6 = inlined_call_operand.hbm [shape: f32[8,128], index: 6, kind: output, shape index: {1}]  }
   0x1   :  { %1995 = sst [smem:[#allocation22_spill]] %s1985_s5 }
   0x2   :  { %12 = vsyncpa [#allocation4], 0 }
   0x3   :  { %14 = vsyncpa [#allocation4 + $0x1], 0 }
   0x4   :  { %15 = vsyncpa [#allocation7], 0 }
   0x5   :  { %16 = vsyncpa [#allocation10], 0 }
   0x6   :  { %17 = vsyncpa [#allocation5], 0 }
   0x7   :  { %19 = vsyncpa [#allocation5 + $0x1], 0 }
   0x8   :  { %20 = vsyncpa [#allocation14], 0  ;;  %s1574_s21 = smov 0   ;;  %s1576_s22 = smov 0  }
   0x9   :  { %s1578_s23 = smov 0   ;;  %s1580_s24 = smov 0  }
   0xa   :  { %s1582_s25 = smov 0   ;;  %s1584_s26 = smov 0  }
   0xb LB: > { %1996 = sst [smem:[#allocation20_spill]] %s1504_s21  ;;  %s924_s27 = sadd.s32 4294967295, %s1524_s26   ;;  %s1524_s26 = sphi %s1584_s26, %s26_s26   ;;  %s1520_s25 = sphi %s1582_s25, %s2021_s25   ;;  %s1516_s24 = sphi %s1580_s24, %s2020_s24   ;;  %s1512_s23 = sphi %s1578_s23, %s2019_s23   ;;  %s1508_s22 = sphi %s1576_s22, %s2018_s22   ;;  %s1504_s21 = sphi %s1574_s21, %s2017_s21  }
   0xc   : > { %s925_s28 = sadd.s32 4294967294, %s1524_s26   ;;  %p60_p0 = scmp.ne.s32.totalorder %s1508_s22, %s1504_s21 }
   0xd   : > { %p1608_p1 = scmp.eq.s32.totalorder %s924_s27, 0  ;;  %p1612_p2 = scmp.eq.s32.totalorder %s924_s27, 1 }
   0xe   : > { %p181_p3 = scmp.eq.s32.totalorder %s925_s28, 1  ;;  %p926_p5 = scmp.ge.s32.totalorder %s1524_s26, 1 }
   0xf   : > { %s1997_s29 = scalar_select %p1608_p1, 1, 0 }
  0x10   : > { %s1998_s30 = scalar_select %p1612_p2, 1, 0 }
  0x11   : > { %p1618_p4 = por %p1608_p1, %p60_p0  ;;  %p1623_p6 = por %p181_p3, %p60_p0 }
  0x12   : > { %p214_p7 = scmp.lt.s32.totalorder %s1524_s26, 3  ;;  %s1526_s10 = smov [#allocation6]  }
  0x13   : > { %s1999_s7 = scalar_select %p1618_p4, 1, 0 }
  0x14   : > { %s2000_s8 = scalar_select %p1623_p6, 1, 0 }
  0x15   : > { %p1628_p8 = pnand %p926_p5, %p214_p7  ;;  %s226_s11 = sshll.u32 %s1526_s10, 4  ;;  %s1632_s11 = int_to_ptr.vmem [resolvable:$true] %s226_s11 }
  0x16   : > { %2001 = sst [smem:[#allocation21_spill]] %s2000_s8  ;;  %s1527_s13 = smov [#allocation9]  }
  0x17   : > { %s2002_s9 = scalar_select %p1628_p8, 1, 0 }
  0x18   : > { %p1144_p9 = pneg %p1628_p8  ;;  %s252_s14 = sshll.u32 %s1527_s13, 4  ;;  %s1643_s14 = int_to_ptr.vmem [resolvable:$true] %s252_s14 }
  0x19   : > { %s1528_s15 = smov [#allocation8]   ;;  %s1262_s19 = scalar_lea.hbm %s1981_s1, 1024 }
  0x1a   : > { %p1639_p11 = pnand %p1144_p9, %p1608_p1  ;;  %s1645_s16 = sshll.u32 %s1528_s15, 4  ;;  %s243_s16 = int_to_ptr.vmem [resolvable:$true] %s1645_s16 }
  0x1b   : > { %p1263_p12 = scmp.ne.s32.totalorder %s1981_s1, %s1262_s19  ;;  %p1269_p5 = scmp.lt.u32.totalorder %s1262_s19, %s1981_s1 }
  0x1c   : > { %p1655_p13 = pneg %p1639_p11 }
  0x1e   : > { %p1265_p0 = pnand %p1655_p13, %p1263_p12 }
  0x20   : > { %p1266_p3 = pneg %p1265_p0 }
  0x22   : > { %p1271_p7 = pnand %p1269_p5, %p1266_p3 }
  0x24   : > { %1274 = shalt.err (!%p1271_p7)
}
  0x25   : > { %s1275_s15 = scalar_lea.vmem %s1632_s11, 1024  ;;  %p1283_p1 = scmp.lt.s32.totalorder %s1632_s11, %s1632_s11 }
  0x26   : > { %p1276_p9 = scmp.ne.s32.totalorder %s1632_s11, %s1275_s15  ;;  %p1284_p4 = scmp.lt.s32.totalorder %s1275_s15, %s1275_s15 }
  0x28   : > { %p1278_p10 = pnand %p1276_p9, %p1655_p13  ;;  %p1285_p12 = por %p1284_p4, %p1283_p1 }
  0x2a   : > { %p1279_p6 = pneg %p1278_p10 }
  0x2c   : > { %p1286_p0 = pnand %p1285_p12, %p1279_p6 }
  0x2e   : > { %1289 = shalt.err (!%p1286_p0)
}
  0x2f   : > { %s1529_s17 = smov 64   ;;  %s1530_s18 = smov 4  }
  0x30   : > { %1147 = dma.hbm_to_vmem [thread:$0]  (!%p1639_p11), %s1981_s1, 1024, %s1632_s11, [#allocation7], %s1529_s17, %s1529_s17, %s1530_s18  }
  0x31   : > { %s1290_s13 = scalar_lea.hbm %s1983_s3, 1024 }
  0x32   : > { %p1291_p1 = scmp.ne.s32.totalorder %s1983_s3, %s1290_s13  ;;  %p1297_p10 = scmp.lt.u32.totalorder %s1290_s13, %s1983_s3 }
  0x34   : > { %p1293_p4 = pnand %p1291_p1, %p1655_p13 }
  0x36   : > { %p1294_p6 = pneg %p1293_p4 }
  0x38   : > { %p1299_p3 = pnand %p1297_p10, %p1294_p6 }
  0x3a   : > { %1302 = shalt.err (!%p1299_p3)
}
  0x3b   : > { %s1303_s11 = scalar_lea.vmem %s1643_s14, 1024  ;;  %p1311_p12 = scmp.lt.s32.totalorder %s1643_s14, %s1643_s14 }
  0x3c   : > { %p1304_p5 = scmp.ne.s32.totalorder %s1643_s14, %s1303_s11  ;;  %p1312_p0 = scmp.lt.s32.totalorder %s1303_s11, %s1303_s11 }
  0x3e   : > { %p1306_p7 = pnand %p1304_p5, %p1655_p13  ;;  %p1313_p1 = por %p1312_p0, %p1311_p12 }
  0x40   : > { %p1307_p9 = pneg %p1306_p7 }
  0x42   : > { %p1314_p4 = pnand %p1313_p1, %p1307_p9 }
  0x44   : > { %1317 = shalt.err (!%p1314_p4)
}
  0x45   : > { %1153 = dma.hbm_to_vmem [thread:$0]  (!%p1639_p11), %s1983_s3, 1024, %s1643_s14, [#allocation10], %s1529_s17, %s1529_s17, %s1530_s18  }
  0x46   : > { %s1318_s20 = scalar_lea.hbm %s1982_s2, 128 }
  0x47   : > { %p1319_p6 = scmp.ne.s32.totalorder %s1982_s2, %s1318_s20  ;;  %p1325_p5 = scmp.lt.u32.totalorder %s1318_s20, %s1982_s2 }
  0x49   : > { %p1321_p10 = pnand %p1319_p6, %p1655_p13 }
  0x4b   : > { %p1322_p3 = pneg %p1321_p10 }
  0x4d   : > { %p1327_p7 = pnand %p1325_p5, %p1322_p3 }
  0x4f   : > { %1330 = shalt.err (!%p1327_p7)
}
  0x50   : > { %s1331_s11 = scalar_lea.vmem %s243_s16, 128  ;;  %p1339_p1 = scmp.lt.s32.totalorder %s243_s16, %s243_s16 }
  0x51   : > { %p1332_p9 = scmp.ne.s32.totalorder %s243_s16, %s1331_s11  ;;  %p1340_p4 = scmp.lt.s32.totalorder %s1331_s11, %s1331_s11 }
  0x53   : > { %p1334_p12 = pnand %p1332_p9, %p1655_p13  ;;  %p1341_p8 = por %p1340_p4, %p1339_p1 }
  0x55   : > { %p1335_p0 = pneg %p1334_p12 }
  0x57   : > { %p1342_p2 = pnand %p1341_p8, %p1335_p0 }
  0x59   : > { %1345 = shalt.err (!%p1342_p2)
}
  0x5a   : > { %1150 = dma.hbm_to_vmem [thread:$0]  (!%p1639_p11), %s1982_s2, 128, %s243_s16, [#allocation7]  }
  0x5b   : > { %s1531_s21 = smov [#allocation11]   ;;  %s1346_s27 = scalar_lea.hbm %s1984_s4, 16 }
  0x5c   : > { %s266_s8 = sshll.u32 %s1531_s21, 4  ;;  %p1347_p6 = scmp.ne.s32.totalorder %s1984_s4, %s1346_s27  ;;  %s267_s8 = int_to_ptr.vmem [resolvable:$true] %s266_s8 }
  0x5d   : > { %p1353_p10 = scmp.lt.u32.totalorder %s1346_s27, %s1984_s4 }
  0x5e   : > { %p1349_p2 = pnand %p1347_p6, %p1655_p13 }
  0x60   : > { %p1350_p8 = pneg %p1349_p2 }
  0x62   : > { %p1355_p3 = pnand %p1353_p10, %p1350_p8 }
  0x64   : > { %1358 = shalt.err (!%p1355_p3)
}
  0x65   : > { %s1359_s16 = scalar_lea.vmem %s267_s8, 16  ;;  %s1366_s14 = scalar_lea.vmem %s267_s8, 32 }
  0x66   : > { %p1360_p5 = scmp.ne.s32.totalorder %s267_s8, %s1359_s16  ;;  %p1367_p12 = scmp.lt.s32.totalorder %s267_s8, %s267_s8 }
  0x67   : > { %p1368_p0 = scmp.lt.s32.totalorder %s1366_s14, %s1359_s16 }
  0x68   : > { %p1362_p7 = pnand %p1360_p5, %p1655_p13 }
  0x69   : > { %p1369_p1 = por %p1368_p0, %p1367_p12 }
  0x6a   : > { %p1363_p9 = pneg %p1362_p7 }
  0x6c   : > { %p1370_p4 = pnand %p1369_p1, %p1363_p9 }
  0x6e   : > { %1373 = shalt.err (!%p1370_p4)
}
  0x6f   : > { %1156 = dma.hbm_to_vmem [thread:$0]  (!%p1639_p11), %s1984_s4, 16, %s267_s8, [#allocation10]  }
  0x70   : > { %s35_s28 = sadd.s32 1, %s1520_s25  ;;  %s47_s19 = sadd.s32 1, %s1512_s23 }
  0x71   : > { %p36_p13 = scmp.ge.s32.totalorder %s35_s28, 2  ;;  %p54_p6 = scmp.ne.s32.totalorder %s1512_s23, %s1508_s22 }
  0x72   : > { %p55_p2 = scmp.eq.s32.totalorder %s1524_s26, 0  ;;  %p1169_p8 = scmp.lt.s32.totalorder %s1524_s26, 2 }
  0x73   : > { %s2023_s28 = smov (%p36_p13, %s35_s28), 0  ;;  %p2005_p3 = scmp.ne.s32.totalorder %s1998_s30, 0 }
  0x74   : > { %p56_p10 = por %p55_p2, %p54_p6  ;;  %s42_s20 = ssub.s32 %s1520_s25, %s2023_s28 }
  0x75   : > { %p1752_p5 = por %p2005_p3, %p54_p6  ;;  %s277_s27 = sand.u32 1, %s1512_s23  }
  0x76   : > { %p45_p7 = scmp.eq.s32.totalorder %s42_s20, 0  ;;  %s932_s8 = sshll.u32 %s277_s27, 4 }
  0x77   : > { %s972_s10 = sshll.u32 %s1520_s25, 8  ;;  %s281_s14 = scalar_lea.vmem [#allocation3], %s932_s8 }
  0x78   : > { %s1761_s13 = scalar_select %p45_p7, %s1512_s23, %s47_s19  }
  0x79   : > { %s1766_s16 = scalar_lea.hbm %s1980_s0, %s972_s10  ;;  %s289_s5 = sshll.u32 %s281_s14, 4  ;;  %s1774_s5 = int_to_ptr.vmem [resolvable:$true] %s289_s5 }
  0x7a   : > { %p1770_p11 = pnand %p1169_p8, %p56_p10  ;;  %s1776_s19 = scalar_lea.sflag [#allocation4], %s277_s27 }
  0x7b   : > { %s1374_s20 = scalar_lea.hbm %s1766_s16, 256  ;;  %s1379_s15 = scalar_lea.hbm %s1980_s0, 512 }
  0x7c   : > { %p1375_p9 = scmp.ne.s32.totalorder %s1766_s16, %s1374_s20  ;;  %p1376_p12 = pneg %p1770_p11 }
  0x7d   : > { %p1380_p4 = scmp.lt.u32.totalorder %s1766_s16, %s1980_s0  ;;  %p1381_p13 = scmp.lt.u32.totalorder %s1379_s15, %s1374_s20 }
  0x7e   : > { %p1377_p0 = pnand %p1376_p12, %p1375_p9  ;;  %p1383_p2 = scmp.lt.u32.totalorder %s1374_s20, %s1766_s16 }
  0x7f   : > { %p1382_p6 = por %p1381_p13, %p1380_p4 }
  0x80   : > { %p1378_p1 = pneg %p1377_p0 }
  0x81   : > { %p1384_p8 = por %p1383_p2, %p1382_p6 }
  0x83   : > { %p1385_p10 = pnand %p1384_p8, %p1378_p1 }
  0x85   : > { %1388 = shalt.err (!%p1385_p10)
}
  0x86   : > { %s1389_s27 = scalar_lea.vmem %s1774_s5, 256  ;;  %s1532_s8 = smov [#allocation3]  }
  0x87   : > { %p1390_p3 = scmp.ne.s32.totalorder %s1774_s5, %s1389_s27  ;;  %s1394_s10 = sshll.u32 %s1532_s8, 4  ;;  %s1395_s10 = int_to_ptr.vmem [resolvable:$false] %s1394_s10 }
  0x88   : > { %s1396_s11 = scalar_lea.vmem %s1395_s10, 512  ;;  %p1397_p0 = scmp.lt.s32.totalorder %s1774_s5, %s1395_s10 }
  0x89   : > { %p1392_p7 = pnand %p1390_p3, %p1376_p12  ;;  %p1398_p4 = scmp.lt.s32.totalorder %s1396_s11, %s1389_s27 }
  0x8b   : > { %p1393_p9 = pneg %p1392_p7  ;;  %p1399_p13 = por %p1398_p4, %p1397_p0 }
  0x8d   : > { %p1400_p6 = pnand %p1399_p13, %p1393_p9 }
  0x8f   : > { %1403 = shalt.err (!%p1400_p6)
}
  0x90   : > { %1160 = dma.hbm_to_vmem [thread:$0]  (!%p1770_p11), %s1766_s16, 256, %s1774_s5, %s1776_s19, %s1529_s17, %s1529_s17, %s1530_s18  }
  0x91   : > { %p2008_p12 = scmp.ne.s32.totalorder %s2002_s9, 0 }
  0x92   : > { %s1810_s20 = sand.u32 (!%p2008_p12), 1, %s1508_s22   ;;  %p2009_p1 = scmp.ne.s32.totalorder (!%p2008_p12), %s1999_s7, 0 }
  0x93   : > { %301 = sbr.rel (%p2008_p12) target bundleno = 1352 (0x548), region = 40  ;;  %s936_s15 = sshll.u32 (!%p2008_p12), %s1810_s20, 4 }
  0x94   : > { %s304_s14 = scalar_lea.sflag (!%p2008_p12), [#allocation4], %s1810_s20  ;;  %s1814_s27 = scalar_lea.vmem (!%p2008_p12), [#allocation3], %s936_s15 }
  0x9a   : > { %1483 = dma.done.wait (%p2009_p1), %s304_s14, 256  }
  0x9b   : > { %1485 = vsyncadd (%p2009_p1), %s304_s14, 4294967040  ;;  %p2010_p11 = scmp.ne.s32.totalorder %s1997_s29, 0 }
  0x9d   : > { %1487 = dma.done.wait (%p2010_p11), [#allocation7], 1152  }
  0x9e   : > { %1489 = vsyncadd (%p2010_p11), [#allocation7], 4294966144 }
  0x9f   : > { %1491 = dma.done.wait (%p2010_p11), [#allocation10], 1040  }
  0xa0   : > { %1493 = vsyncadd (%p2010_p11), [#allocation10], 4294966256  ;;  %s941_s9 = sshll.u32 %s1810_s20, 5  ;;  %p942_p2 = scmp.ne.s32.totalorder %s1516_s24, 0 }
  0xa1   : > { %s1829_s17 = scalar_lea.vmem [#allocation12], %s941_s9  ;;  %v359_v0 = vld [vmem:[#allocation8] sm:$0xff] (!%p942_p2) }
  0xa2   : > { %358 = sbr.rel (%p942_p2) target bundleno = 169 (0xa9), region = 64  ;;  %360 = vst [vmem:[#allocation13] sm:$0xff] (!%p942_p2), %v359_v0 }
  0xa9 PF: > { %v1832_v1 = vld [vmem:[#allocation6] sm:$0xff]   ;;  %v1533_v2 = vmov 0.0   ;;  %v1837_v3 = vld [vmem:[#allocation6 + $0x8] sm:$0xff]   ;;  %vm1534_vm0 = vmmov 0   ;;  %v1847_v4 = vld [vmem:[#allocation6 + $0x10] sm:$0xff]   ;;  %s1535_s29 = smov [#allocation13]  }
  0xaa   : > { %1020 = vmatprep.subr.bf16.mxu0 %v1533_v2  ;;  %1040 = vmatprep.subr.bf16.mxu1 %v1533_v2  ;;  %v1851_v5 = vld [vmem:[#allocation6 + $0x18] sm:$0xff]   ;;  %v1240_v6 = vld [vmem:[#allocation6 + $0x20] sm:$0xff]   ;;  %v1241_v7 = vld [vmem:[#allocation6 + $0x28] sm:$0xff]   ;;  %s789_s7 = sshll.u32 %s1535_s29, 4  ;;  %p2011_p10 = scmp.ne.s32.totalorder %s1998_s30, 0  ;;  %s790_s7 = int_to_ptr.vmem [resolvable:$true] %s789_s7 }
  0xab   : > { %1021 = vmatpush3.bf16.msra.mxu0 %v1832_v1  ;;  %1036 = vmatprep.mubr.msk.bf16.mxu0 %vm1534_vm0, %v1533_v2  ;;  %v1242_v8 = vld [vmem:[#allocation6 + $0x30] sm:$0xff]   ;;  %v1243_v9 = vld [vmem:[#allocation6 + $0x38] sm:$0xff]   ;;  %v1245_v30 = vld [vmem:[#allocation9] sm:$0xff]   ;;  %s1404_s18 = scalar_lea.vmem %s790_s7, 128  ;;  %p1411_p9 = scmp.lt.s32.totalorder %s790_s7, %s790_s7 }
  0xac   : > { %1022 = vmatprep.subr.bf16.mxu0 %v1533_v2  ;;  %1041 = vmatpush3.bf16.msra.mxu1 %v1832_v1  ;;  %v377_v10 = vld [vmem:[#allocation13] sm:$0xff]  ;;  %v1247_v41 = vld [vmem:[#allocation9 + $0x10] sm:$0xff]   ;;  %v1248_v42 = vld [vmem:[#allocation9 + $0x18] sm:$0xff]   ;;  %p1405_p8 = scmp.ne.s32.totalorder %s790_s7, %s1404_s18  ;;  %p1412_p0 = scmp.lt.s32.totalorder %s1404_s18, %s1404_s18 }
  0xad   : > { %1042 = vmatprep.subr.bf16.mxu1 %v1533_v2  ;;  %1056 = vmatprep.mubr.msk.bf16.mxu1 %vm1534_vm0, %v1533_v2  ;;  %v380_v11 = vpack.c.bf16 %v377_v10, %v377_v10  ;;  %v378_v12 = vld [vmem:[%s1814_s27] sm:$0xff]   ;;  %v952_v32 = vld [vmem:[%s1814_s27 + $0x8] sm:$0xff]  }
  0xae   : > { %v379_v13 = vunpack.c.l.bf16 %v378_v12  ;;  %v475_v21 = vunpack.c.h.bf16 %v378_v12  ;;  %v1246_v31 = vld [vmem:[#allocation9 + $0x8] sm:$0xff]   ;;  %v523_v33 = vunpack.c.l.bf16 %v952_v32  ;;  %v1249_v43 = vld [vmem:[#allocation9 + $0x20] sm:$0xff]   ;;  %v1251_v45 = vld [vmem:[#allocation9 + $0x30] sm:$0xff]   ;;  %v571_v47 = vunpack.c.h.bf16 %v952_v32  ;;  %p1406_p3 = pnand %p1405_p8, %p2011_p10  ;;  %p1413_p4 = por %p1412_p0, %p1411_p9 }
  0xaf   : > { %1023 = vmatpush3.bf16.msra.mxu0 %v1837_v3  ;;  %v1250_v44 = vld [vmem:[#allocation9 + $0x28] sm:$0xff]   ;;  %v1252_v46 = vld [vmem:[#allocation9 + $0x38] sm:$0xff]  }
  0xb0   : > { %1024 = vmatprep.subr.bf16.mxu0 %v1533_v2  ;;  %1043 = vmatpush3.bf16.msra.mxu1 %v1837_v3  ;;  %p1407_p7 = pneg %p1406_p3 }
  0xb1   : > { %1044 = vmatprep.subr.bf16.mxu1 %v1533_v2 }
  0xb2   : > { %p1414_p13 = pnand %p1413_p4, %p1407_p7 }
  0xb3   : > { %1025 = vmatpush3.bf16.msra.mxu0 %v1847_v4 }
  0xb4   : > { %1026 = vmatprep.subr.bf16.mxu0 %v1533_v2  ;;  %1045 = vmatpush3.bf16.msra.mxu1 %v1847_v4 }
  0xb5   : > { %1046 = vmatprep.subr.bf16.mxu1 %v1533_v2 }
  0xb7   : > { %1027 = vmatpush3.bf16.msra.mxu0 %v1851_v5 }
  0xb8   : > { %1028 = vmatprep.subr.bf16.mxu0 %v1533_v2  ;;  %1047 = vmatpush3.bf16.msra.mxu1 %v1851_v5 }
  0xb9   : > { %1048 = vmatprep.subr.bf16.mxu1 %v1533_v2 }
  0xbb   : > { %1029 = vmatpush3.bf16.msra.mxu0 %v1240_v6 }
  0xbc   : > { %1030 = vmatprep.subr.bf16.mxu0 %v1533_v2  ;;  %1049 = vmatpush3.bf16.msra.mxu1 %v1240_v6 }
  0xbd   : > { %1050 = vmatprep.subr.bf16.mxu1 %v1533_v2 }
  0xbf   : > { %1031 = vmatpush3.bf16.msra.mxu0 %v1241_v7 }
  0xc0   : > { %1032 = vmatprep.subr.bf16.mxu0 %v1533_v2  ;;  %1051 = vmatpush3.bf16.msra.mxu1 %v1241_v7 }
  0xc1   : > { %1052 = vmatprep.subr.bf16.mxu1 %v1533_v2 }
  0xc3   : > { %1033 = vmatpush3.bf16.msra.mxu0 %v1242_v8 }
  0xc4   : > { %1034 = vmatprep.subr.bf16.mxu0 %v1533_v2  ;;  %1053 = vmatpush3.bf16.msra.mxu1 %v1242_v8 }
  0xc5   : > { %1054 = vmatprep.subr.bf16.mxu1 %v1533_v2 }
  0xc7   : > { %1035 = vmatpush3.bf16.msra.mxu0 %v1243_v9 }
  0xc8   : > { %1055 = vmatpush3.bf16.msra.mxu1 %v1243_v9  ;;  %1060 = vmatprep.subr.bf16.mxu0 %v1533_v2 }
  0xc9   : > { %1080 = vmatprep.subr.bf16.mxu1 %v1533_v2 }
  0xca   : > { %1037 = vmatmul.mubr.bf16.vlgmr.msra.gmra.mrb[0].mxu0 %v380_v11 }
  0xcb   : > { %1061 = vmatpush3.bf16.msra.mxu0 %v1832_v1  ;;  %1076 = vmatprep.mubr.msk.bf16.mxu0 %vm1534_vm0, %v1533_v2 }
  0xcc   : > { %1062 = vmatprep.subr.bf16.mxu0 %v1533_v2 }
  0xcf   : > { %1063 = vmatpush3.bf16.msra.mxu0 %v1837_v3 }
  0xd0   : > { %1064 = vmatprep.subr.bf16.mxu0 %v1533_v2 }
  0xd3   : > { %1065 = vmatpush3.bf16.msra.mxu0 %v1847_v4 }
  0xd4   : > { %1066 = vmatprep.subr.bf16.mxu0 %v1533_v2 }
  0xd7   : > { %1067 = vmatpush3.bf16.msra.mxu0 %v1851_v5 }
  0xd8   : > { %1068 = vmatprep.subr.bf16.mxu0 %v1533_v2 }
  0xdb   : > { %1069 = vmatpush3.bf16.msra.mxu0 %v1240_v6 }
  0xdc   : > { %1070 = vmatprep.subr.bf16.mxu0 %v1533_v2 }
  0xdf   : > { %1071 = vmatpush3.bf16.msra.mxu0 %v1241_v7 }
  0xe0   : > { %1072 = vmatprep.subr.bf16.mxu0 %v1533_v2 }
  0xe3   : > { %1073 = vmatpush3.bf16.msra.mxu0 %v1242_v8 }
  0xe4   : > { %1074 = vmatprep.subr.bf16.mxu0 %v1533_v2 }
  0xe7   : > { %1075 = vmatpush3.bf16.msra.mxu0 %v1243_v9 }
  0xe8   : > { %1100 = vmatprep.subr.bf16.mxu0 %v1245_v30 }
 0x19d   : > { %v463_v14 = vpop.f32.mrb[0].mxu0 }
 0x19e   : > { %v469_v15 = vadd.f32 %v463_v14, %v379_v13  ;;  %v1038_v16 = vpop.f32.mrb[1].mxu0 }
 0x19f   : > { %v466_v17 = vpop.f32.mrb[2].mxu0 }
 0x1a0   : > { %1254 = vtanh.f32 %v469_v15  ;;  %v1039_v18 = vpop.f32.mrb[3].mxu0 }
 0x1aa   : > { %v1255_v19 = vpop.eup %1254 }
 0x1ab   : > { %v471_v20 = vpack.c.bf16 %v1255_v19, %v1255_v19 }
 0x1ad   : > { %472 = vst [vmem:[#allocation2] sm:$0xf] %v471_v20  ;;  %1057 = vmatmul.mubr.bf16.vlgmr.msra.gmra.mrb[0].mxu1 %v471_v20 }
 0x1ae   : > { %1081 = vmatpush3.bf16.msra.mxu1 %v1832_v1  ;;  %1096 = vmatprep.mubr.msk.bf16.mxu1 %vm1534_vm0, %v1533_v2 }
 0x1af   : > { %1082 = vmatprep.subr.bf16.mxu1 %v1533_v2 }
 0x1b2   : > { %1083 = vmatpush3.bf16.msra.mxu1 %v1837_v3 }
 0x1b3   : > { %1084 = vmatprep.subr.bf16.mxu1 %v1533_v2 }
 0x1b6   : > { %1085 = vmatpush3.bf16.msra.mxu1 %v1847_v4 }
 0x1b7   : > { %1086 = vmatprep.subr.bf16.mxu1 %v1533_v2 }
 0x1ba   : > { %1087 = vmatpush3.bf16.msra.mxu1 %v1851_v5 }
 0x1bb   : > { %1088 = vmatprep.subr.bf16.mxu1 %v1533_v2 }
 0x1be   : > { %1089 = vmatpush3.bf16.msra.mxu1 %v1240_v6 }
 0x1bf   : > { %1090 = vmatprep.subr.bf16.mxu1 %v1533_v2 }
 0x1c2   : > { %1091 = vmatpush3.bf16.msra.mxu1 %v1241_v7 }
 0x1c3   : > { %1092 = vmatprep.subr.bf16.mxu1 %v1533_v2 }
 0x1c6   : > { %1093 = vmatpush3.bf16.msra.mxu1 %v1242_v8 }
 0x1c7   : > { %1094 = vmatprep.subr.bf16.mxu1 %v1533_v2 }
 0x1ca   : > { %1095 = vmatpush3.bf16.msra.mxu1 %v1243_v9 }
 0x280   : > { %v510_v22 = vpop.f32.mrb[0].mxu1 }
 0x281   : > { %v516_v23 = vadd.f32 %v510_v22, %v475_v21  ;;  %v1058_v24 = vpop.f32.mrb[1].mxu1 }
 0x282   : > { %v513_v25 = vpop.f32.mrb[2].mxu1 }
 0x283   : > { %1256 = vtanh.f32 %v516_v23  ;;  %v1059_v26 = vpop.f32.mrb[3].mxu1 }
 0x28d   : > { %v1257_v27 = vpop.eup %1256 }
 0x28e   : > { %v518_v28 = vpack.c.bf16 %v1257_v27, %v1257_v27 }
 0x290   : > { %520 = vst [vmem:[#allocation2 + $0x4] sm:$0xf] %v518_v28  ;;  %1077 = vmatmul.mubr.bf16.vlgmr.msra.gmra.mrb[4].mxu0 %v518_v28 }
 0x291   : > { %1101 = vmatpush3.bf16.msra.mxu0 %v1245_v30 }
 0x292   : > { %1102 = vmatprep.subr.bf16.mxu0 %v1246_v31 }
 0x295   : > { %1103 = vmatpush3.bf16.msra.mxu0 %v1246_v31 }
 0x296   : > { %1104 = vmatprep.subr.bf16.mxu0 %v1247_v41 }
 0x297   : > { %v1244_v29 = vld [vmem:[#allocation2] sm:$0xff]  }
 0x298   : > { %1116 = vmatprep.mubr.bf16.mxu0 %v1244_v29 }
 0x299   : > { %1105 = vmatpush3.bf16.msra.mxu0 %v1247_v41 }
 0x29a   : > { %1106 = vmatprep.subr.bf16.mxu0 %v1248_v42 }
 0x29d   : > { %1107 = vmatpush3.bf16.msra.mxu0 %v1248_v42 }
 0x29e   : > { %1108 = vmatprep.subr.bf16.mxu0 %v1249_v43 }
 0x2a1   : > { %1109 = vmatpush3.bf16.msra.mxu0 %v1249_v43 }
 0x2a2   : > { %1110 = vmatprep.subr.bf16.mxu0 %v1250_v44 }
 0x2a5   : > { %1111 = vmatpush3.bf16.msra.mxu0 %v1250_v44 }
 0x2a6   : > { %1112 = vmatprep.subr.bf16.mxu0 %v1251_v45 }
 0x2a9   : > { %1113 = vmatpush3.bf16.msra.mxu0 %v1251_v45 }
 0x2aa   : > { %1114 = vmatprep.subr.bf16.mxu0 %v1252_v46 }
 0x2ad   : > { %1115 = vmatpush3.bf16.msra.mxu0 %v1252_v46 }
 0x363   : > { %v558_v34 = vpop.f32.mrb[4].mxu0 }
 0x364   : > { %v564_v35 = vadd.f32 %v558_v34, %v523_v33  ;;  %v1078_v36 = vpop.f32.mrb[5].mxu0 }
 0x365   : > { %v561_v37 = vpop.f32.mrb[6].mxu0 }
 0x366   : > { %1258 = vtanh.f32 %v564_v35  ;;  %v1079_v38 = vpop.f32.mrb[7].mxu0 }
 0x370   : > { %v1259_v39 = vpop.eup %1258 }
 0x371   : > { %v566_v40 = vpack.c.bf16 %v1259_v39, %v1259_v39 }
 0x373   : > { %568 = vst [vmem:[#allocation2 + $0x8] sm:$0xf] %v566_v40  ;;  %1097 = vmatmul.mubr.bf16.vlgmr.msra.gmra.mrb[4].mxu1 %v566_v40 }
 0x446   : > { %v606_v48 = vpop.f32.mrb[4].mxu1 }
 0x447   : > { %v612_v49 = vadd.f32 %v606_v48, %v571_v47  ;;  %v1098_v50 = vpop.f32.mrb[5].mxu1 }
 0x448   : > { %v609_v51 = vpop.f32.mrb[6].mxu1 }
 0x449   : > { %1260 = vtanh.f32 %v612_v49  ;;  %v1099_v52 = vpop.f32.mrb[7].mxu1 }
 0x453   : > { %v1261_v53 = vpop.eup %1260 }
 0x454   : > { %v614_v54 = vpack.c.bf16 %v1261_v53, %v1261_v53  ;;  %617 = vst [vmem:[#allocation13] sm:$0xff] %v1261_v53 }
 0x456   : > { %616 = vst [vmem:[#allocation2 + $0xc] sm:$0xf] %v614_v54 }
 0x45d   : > { %v1253_v55 = vld [vmem:[#allocation2 + $0x8] sm:$0xff]  }
 0x45e   : > { %1117 = vmatmul.mubr.bf16.vlgmr.msra.gmra.mrb[8].mxu0 %v1253_v55 }
 0x45f   : > { %1417 = shalt.err (!%p1414_p13)
}
 0x460   : > { %s1418_s21 = scalar_lea.hbm %s1986_s6, 128 }
 0x461   : > { %p1419_p6 = scmp.ne.s32.totalorder %s1986_s6, %s1418_s21  ;;  %p1424_p11 = scmp.lt.u32.totalorder %s1418_s21, %s1986_s6 }
 0x463   : > { %p1420_p12 = pnand %p1419_p6, %p2011_p10 }
 0x465   : > { %p1421_p1 = pneg %p1420_p12 }
 0x467   : > { %p1426_p2 = pnand %p1424_p11, %p1421_p1 }
 0x469   : > { %1429 = shalt.err (!%p1426_p2)
}
 0x46a   : > { %1140 = dma.vmem_to_hbm [thread:$0]  (%p2011_p10), %s790_s7, 128, %s1986_s6, [#allocation14]   ;;  %v954_v56 = vld [vmem:[#allocation11] ss:$0 sm:$0xff] }
 0x46b   : > { %s973_s27 = sshll.u32 %s1516_s24, 9  ;;  %s773_s9 = sshll.u32 %s1829_s17, 4  ;;  %s1924_s9 = int_to_ptr.vmem [resolvable:$true] %s773_s9 }
 0x46c   : > { %s2012_s16 = sld [smem:[#allocation22_spill]]  ;;  %s759_s24 = scalar_lea.sflag [#allocation5], %s1810_s20 }
 0x46d   : > { %s1430_s7 = scalar_lea.vmem %s1924_s9, 512  ;;  %s1536_s21 = smov [#allocation12]  }
 0x46e   : > { %p1431_p8 = scmp.ne.s32.totalorder %s1924_s9, %s1430_s7  ;;  %s1434_s19 = sshll.u32 %s1536_s21, 4  ;;  %s1435_s19 = int_to_ptr.vmem [resolvable:$false] %s1434_s19 }
 0x46f   : > { %s1436_s8 = scalar_lea.vmem %s1435_s19, 1024  ;;  %p1437_p9 = scmp.lt.s32.totalorder %s1924_s9, %s1435_s19 }
 0x470   : > { %p1432_p3 = pnand %p1431_p8, %p1752_p5  ;;  %p1438_p0 = scmp.lt.s32.totalorder %s1436_s8, %s1430_s7 }
 0x472   : > { %s1922_s5 = scalar_lea.hbm %s2012_s16, %s973_s27  ;;  %p1433_p7 = pneg %p1432_p3 }
 0x473   : > { %p1439_p4 = por %p1438_p0, %p1437_p9 }
 0x475   : > { %p1440_p13 = pnand %p1439_p4, %p1433_p7 }
 0x531   : > { %v1118_v57 = vpop.f32.mrb[8].mxu0 }
 0x532   : > { %v748_v58 = vadd.f32 %v1118_v57, %v954_v56  ;;  %v739_v59 = vpop.f32.mrb[9].mxu0 }
 0x533   : > { %v740_v60 = vadd.f32 %v954_v56, %v739_v59  ;;  %v1119_v61 = vpop.f32.mrb[10].mxu0 }
 0x534   : > { %756 = vst [vmem:[%s1829_s17 + $0x10] sm:$0xff] %v748_v58  ;;  %v751_v62 = vadd.f32 %v1119_v61, %v954_v56  ;;  %v742_v63 = vpop.f32.mrb[11].mxu0 }
 0x535   : > { %754 = vst [vmem:[%s1829_s17] sm:$0xff] %v740_v60  ;;  %v743_v0 = vadd.f32 %v954_v56, %v742_v63 }
 0x536   : > { %757 = vst [vmem:[%s1829_s17 + $0x18] sm:$0xff] %v751_v62 }
 0x537   : > { %755 = vst [vmem:[%s1829_s17 + $0x8] sm:$0xff] %v743_v0 }
 0x538   : > { %1443 = shalt.err (!%p1440_p13)
}
 0x539   : > { %s1444_s17 = scalar_lea.hbm %s1922_s5, 512  ;;  %s1448_s15 = scalar_lea.hbm %s2012_s16, 1024 }
 0x53a   : > { %p1445_p6 = scmp.ne.s32.totalorder %s1922_s5, %s1444_s17  ;;  %p1449_p11 = scmp.lt.u32.totalorder %s1922_s5, %s2012_s16 }
 0x53b   : > { %p1450_p2 = scmp.lt.u32.totalorder %s1448_s15, %s1444_s17  ;;  %p1452_p3 = scmp.lt.u32.totalorder %s1444_s17, %s1922_s5 }
 0x53c   : > { %p1446_p12 = pnand %p1445_p6, %p1752_p5 }
 0x53d   : > { %p1451_p8 = por %p1450_p2, %p1449_p11 }
 0x53e   : > { %p1447_p1 = pneg %p1446_p12 }
 0x53f   : > { %p1453_p7 = por %p1452_p3, %p1451_p8 }
 0x541   : > { %p1454_p9 = pnand %p1453_p7, %p1447_p1 }
 0x543   : > { %1457 = shalt.err (!%p1454_p9)
}
 0x544   : > { %s1537_s29 = smov 128   ;;  %s1538_s18 = smov 8  }
 0x545   : > { %1138 = dma.vmem_to_hbm [thread:$0]  (%p1752_p5), %s1924_s9, 512, %s1922_s5, %s759_s24, %s1537_s29, %s1537_s29, %s1538_s18  }
 0x546   : > { %1495 = dma.done.wait (%p2011_p10), [#allocation14], 128  }
 0x547   : > { %1497 = vsyncadd (%p2011_p10), [#allocation14], 4294967168 }
 0x548 PF: > { %s2013_s7 = sld [smem:[#allocation20_spill]]  ;;  %s2014_s21 = sld [smem:[#allocation21_spill]] }
 0x549   : > { %p2016_p4 = scmp.ge.s32.totalorder %s1524_s26, 2 }
 0x54e   : > { %s805_s19 = sand.u32 1, %s2013_s7   ;;  %p2015_p0 = scmp.ne.s32.totalorder %s2014_s21, 0 }
 0x54f   : > { %s806_s8 = scalar_lea.sflag [#allocation5], %s805_s19 }
 0x550   : > { %p1162_p13 = pnand %p2016_p4, %p2015_p0 }
 0x552   : > { %1499 = dma.done.wait (!%p1162_p13), %s806_s8, 512  }
 0x553   : > { %1501 = vsyncadd (!%p1162_p13), %s806_s8, 4294966784  ;;  %s26_s26 = sadd.s32 1, %s1524_s26   ;;  %s2017_s21 = smov %s1508_s22 }
 0x554   : > { %p23_p6 = scmp.ge.s32.totalorder %s26_s26, 4   ;;  %s2018_s22 = smov %s1512_s23 }
 0x555   : > { %s2019_s23 = smov %s1761_s13  ;;  %s2020_s24 = smov %s1520_s25 }
 0x556   : > { %s2021_s25 = smov %s2023_s28  ;;  %25 = sbr.rel (!%p23_p6) target bundleno = 11 (0xb), region = 121 }
 0x55d   :  { %811 = vsyncpa [#allocation4], 1 }
 0x55e   :  { %813 = vsyncpa [#allocation4 + $0x1], 1 }
 0x55f   :  { %814 = vsyncpa [#allocation7], 1 }
 0x560   :  { %815 = vsyncpa [#allocation10], 1 }
 0x561   :  { %816 = vsyncpa [#allocation5], 1 }
 0x562   :  { %818 = vsyncpa [#allocation5 + $0x1], 1 }
 0x563   :  { %819 = vsyncpa [#allocation14], 1 }

</bundles_post_ra>
